<compile_context>
chip_gen: v5e
topology: v5e:2x2
jax: 0.10.0
libtpu: 0.0.40
codegen_flags: <defaults>
</compile_context>

<pallas_src>
import jax
import jax.numpy as jnp
from jax.experimental import pallas as pl
from jax.experimental.pallas import tpu as pltpu


def flatten(x: jax.Array) -> jax.Array:
    """Preferred implementation: (N, C, 1, 1) -> (N, C) is a free reshape."""
    assert x.ndim == 4 and x.shape[2] == 1 and x.shape[3] == 1, (
        "Flatten expects (N, C, 1, 1)"
    )
    return x.reshape(x.shape[0], x.shape[1])


def _make_dma_copy_kernel(chunk_rows: int):
    """Kernel: copy one contiguous row-chunk HBM -> HBM via async DMA."""

    def kernel(x_hbm, o_hbm, sem):
        i = pl.program_id(0)
        start = pl.multiple_of(i * chunk_rows, chunk_rows)
        cp = pltpu.make_async_copy(
            x_hbm.at[pl.ds(start, chunk_rows), :],
            o_hbm.at[pl.ds(start, chunk_rows), :],
            sem,
        )
        cp.start()
        cp.wait()

    return kernel


def flatten_pallas(x: jax.Array) -> jax.Array:
    """Pallas version of Flatten.forward (x[:, :, 0, 0]) that materializes a copy.

    The TensorCore only issues DMA descriptors; data moves HBM -> HBM directly.
    For a standalone op, `flatten()` above is strictly better (pure reshape).
    """
    assert x.ndim == 4 and x.shape[2] == 1 and x.shape[3] == 1, (
        "Flatten expects (N, C, 1, 1)"
    )
    n, c, _, _ = x.shape
    total = n * c
    itemsize = jnp.dtype(x.dtype).itemsize

    # Metadata-only reshape to a contiguous 2-D view of the flat buffer.
    # Lane-dense (rows, 128) when possible; otherwise fall back to (N, C).
    if total % 128 == 0:
        rows, width = total // 128, 128
    else:
        rows, width = n, c
    x2 = x.reshape(rows, width)

    # Chunking: each chunk >= ~2 MiB (or the whole array), at most 8 chunks,
    # and chunk count must evenly divide `rows` so every DMA has the same
    # static size.  >=2 chunks lets v7x's two TensorCores drive separate DMAs;
    # no VMEM is used, so there is no scoped-VMEM budget to worry about on any
    # of v5e / v6e / v7x.
    total_bytes = total * itemsize
    max_chunks = int(max(1, min(8, total_bytes // (2 << 20))))
    num_chunks = 1
    for d in range(1, max_chunks + 1):
        if rows % d == 0:
            num_chunks = d
    chunk_rows = rows // num_chunks

    out2 = pl.pallas_call(
        _make_dma_copy_kernel(chunk_rows),
        out_shape=jax.ShapeDtypeStruct((rows, width), x.dtype),
        grid=(num_chunks,),
        in_specs=[pl.BlockSpec(memory_space=pl.ANY)],
        out_specs=pl.BlockSpec(memory_space=pl.ANY),
        scratch_shapes=[pltpu.SemaphoreType.DMA(())],
        compiler_params=pltpu.CompilerParams(
            # Parallel grid axis: v7x's two TensorCores split the chunk loop;
            # harmless no-op on single-core v5e / v6e.
            dimension_semantics=("parallel",),
        ),
    )(x2)

    # Metadata-only reshape back to the module's output shape.
    return out2.reshape(n, c)


if __name__ == "__main__":
    key = jax.random.PRNGKey(0)

    # Shape consistent with the module's forward: H == W == 1 is asserted.
    x = jax.random.normal(key, (2, 4, 1, 1), dtype=jnp.float32)
    ref = x[:, :, 0, 0]

    # Preferred (free) path.
    out_free = flatten(x)
    jax.block_until_ready(out_free)
    assert out_free.shape == (2, 4) and out_free.dtype == x.dtype
    assert jnp.array_equal(out_free, ref), "reshape flatten mismatch"

    # Pallas HBM->HBM DMA path ((N,C) fallback view: 8 elems, not 128-divisible).
    out = flatten_pallas(x)
    jax.block_until_ready(out)
    assert out.shape == (2, 4) and out.dtype == x.dtype
    assert jnp.array_equal(out, ref), "Pallas flatten mismatch vs reference"

    # Second small case that exercises the lane-dense (rows, 128) view.
    key2 = jax.random.PRNGKey(1)
    x2 = jax.random.normal(key2, (4, 512, 1, 1), dtype=jnp.float32)
    ref2 = x2[:, :, 0, 0]
    out2 = flatten_pallas(x2)
    jax.block_until_ready(out2)
    assert out2.shape == (4, 512) and out2.dtype == x2.dtype
    assert jnp.array_equal(out2, ref2), "Pallas flatten mismatch (lane-dense path)"

    print("KERNEL_OK")
</pallas_src>

<mosaic_0001>
module attributes {stable_mosaic.version = 11 : i64} {
  func.func @kernel(%arg0: i32, %arg1: memref<2x4xf32, #tpu.memory_space<any>>, %arg2: memref<2x4xf32, #tpu.memory_space<any>>, %arg3: memref<!tpu.dma_semaphore, #tpu.memory_space<semaphore_mem>>) attributes {dimension_semantics = [#tpu.dimension_semantics<parallel>], iteration_bounds = array<i64: 1>, scalar_prefetch = 0 : i64, scratch_operands = 1 : i64, tpu.core_type = #tpu.core_type<tc>, window_params = [{}, {}]} {
    %c2_i32 = arith.constant 2 : i32
    %0 = arith.muli %arg0, %c2_i32 : i32
    %1 = tpu.assume_multiple %0, 2 : i32
    %c0_i32 = arith.constant 0 : i32
    %2 = tpu.memref_slice %arg1[%1, %c0_i32] : memref<2x4xf32, #tpu.memory_space<any>> -> memref<2x4xf32, #tpu.memory_space<any>>
    %c0_i32_0 = arith.constant 0 : i32
    %3 = tpu.memref_slice %arg2[%1, %c0_i32_0] : memref<2x4xf32, #tpu.memory_space<any>> -> memref<2x4xf32, #tpu.memory_space<any>>
    tpu.enqueue_dma source(%2 : memref<2x4xf32, #tpu.memory_space<any>>) target(%3 : memref<2x4xf32, #tpu.memory_space<any>>) target_semaphore(%arg3 : memref<!tpu.dma_semaphore, #tpu.memory_space<semaphore_mem>>)
    %c0_i32_1 = arith.constant 0 : i32
    %4 = tpu.memref_slice %arg1[%1, %c0_i32_1] : memref<2x4xf32, #tpu.memory_space<any>> -> memref<2x4xf32, #tpu.memory_space<any>>
    %c0_i32_2 = arith.constant 0 : i32
    %5 = tpu.memref_slice %arg2[%1, %c0_i32_2] : memref<2x4xf32, #tpu.memory_space<any>> -> memref<2x4xf32, #tpu.memory_space<any>>
    tpu.wait_dma2 semaphore(%arg3 : memref<!tpu.dma_semaphore, #tpu.memory_space<semaphore_mem>>) src(%4 : memref<2x4xf32, #tpu.memory_space<any>>) dst(%5 : memref<2x4xf32, #tpu.memory_space<any>>)
    return
  }
}

</mosaic_0001>

<bundles_post_ra>
// kernel: tpu_custom_call.1
= control target key start
LH: loop header
LB: loop body
LE: loop exit
PB: predicated region body
PF: predicated region fallthrough
CT: control target
= control target key end

     0   :  { %s35_s12 = smov [#allocation2]   ;;  %s36_s13 = smov [#allocation3]   ;;  %s54_s0 = inlined_call_operand.hbm [shape: f32[2,4], index: 0, kind: input, shape index: {}]   ;;  %s55_s1 = inlined_call_operand.hbm [shape: f32[2,4], index: 1, kind: output, shape index: {}]  }
   0x1   :  { %s13_s8 = sshll.u32 %s54_s0, 4  ;;  %s15_s11 = sshll.u32 %s55_s1, 4  ;;  %s14_s8 = int_to_ptr.hbm [resolvable:$true] %s13_s8  ;;  %s16_s11 = int_to_ptr.hbm [resolvable:$true] %s15_s11 }
   0x2   :  { %s37_s14 = smov 0  }
   0x3   :  { %19 = dma.general %s14_s8, 32, %s16_s11, %s35_s12, %s36_s13, [#allocation4], %s37_s14, 0  }
   0x4   :  { %33 = dma.done.wait [#allocation2], 32 }
   0x5   :  { %34 = vsyncadd [#allocation2], 4294967264 }
   0x6   :  { %23 = vsyncmov [#allocation2] }
   0x9   :  { %s24_s15 = vpop.sfrf %23 }
   0xa   :  { %p29_p0 = scmp.ne.s32.totalorder %s24_s15, 0 }
   0xc   :  { %28 = shalt.err (%p29_p0)  }

</bundles_post_ra>
